<compile_context>
chip_gen: v7x
topology: tpu7x:2x2x1
jax: 0.10.0
libtpu: 0.0.40
codegen_flags: <defaults>
</compile_context>

<pallas_src>
import functools
import numpy as np
import jax
import jax.numpy as jnp
from jax import lax
from jax.experimental import pallas as pl
from jax.experimental.pallas import tpu as pltpu

LN_EPS = 1e-5                 # torch.nn.LayerNorm default
BF16 = jnp.bfloat16
ACT_DTYPE = jnp.bfloat16      # inter-kernel residual-stream dtype (f32 math inside)

# Demo-safe scoped-VMEM budget; retune per generation once real-size tiling exists.
_CP = pltpu.CompilerParams(dimension_semantics=("parallel",),
                           vmem_limit_bytes=32 * 1024 * 1024)


# ----------------------------- small helpers -----------------------------

def _round_up(x, m):
    return ((x + m - 1) // m) * m


def _ln(x, w, b):
    """LayerNorm over the last dim, f32 math.  w, b are (1, D)."""
    mu = jnp.mean(x, axis=-1, keepdims=True)
    var = jnp.mean((x - mu) ** 2, axis=-1, keepdims=True)
    return (x - mu) * lax.rsqrt(var + LN_EPS) * w + b


def _const_spec(shape):
    """Operand whose block is the whole array at every grid step (weights etc.)."""
    nd = len(shape)
    return pl.BlockSpec(shape, lambda b, _n=nd: (0,) * _n)


def _batch_spec(tail):
    """Leading batch dim indexed by the grid, squeezed out of the kernel ref."""
    nd = len(tail)
    return pl.BlockSpec((None,) + tuple(tail), lambda b, _n=nd: (b,) + (0,) * _n)


# ----------------------------- Pallas kernels -----------------------------

def _embed_kernel(x_ref, w_ref, b_ref, pos_ref, o_ref):
    # enc_proj (Conv2d(1,E,(1,in_dim)) == per-token Linear) fused with pos-emb add.
    y = jnp.dot(x_ref[...].astype(BF16), w_ref[...],
                preferred_element_type=jnp.float32)
    o_ref[...] = (y + b_ref[...] + pos_ref[...]).astype(o_ref.dtype)


def _ln_linear_kernel(x_ref, nw_ref, nb_ref, w_ref, b_ref, o_ref):
    # enc_norm fused into dec_proj: LN -> Linear.
    xn = _ln(x_ref[...].astype(jnp.float32), nw_ref[...], nb_ref[...])
    y = jnp.dot(xn.astype(BF16), w_ref[...], preferred_element_type=jnp.float32)
    o_ref[...] = (y + b_ref[...]).astype(o_ref.dtype)


def _pred_loss_kernel(x_ref, nw_ref, nb_ref, w_ref, b_ref, t_ref,
                      o_ref, loss_ref, *, denom, seqlen):
    # dec_norm + dec_pred + per-batch MSE partial sum.  Only rows 1..seqlen
    # (real tokens, not cls / not pad) contribute to the loss — mask is
    # generated in-kernel with iota (no mask tensor in HBM).
    x = x_ref[...].astype(jnp.float32)                      # (Lp, Dd)
    xn = _ln(x, nw_ref[...], nb_ref[...])
    y = jnp.dot(xn.astype(BF16), w_ref[...], preferred_element_type=jnp.float32)
    y = y + b_ref[...]
    o_ref[...] = y.astype(o_ref.dtype)

    Lp, Dout = y.shape
    row_id = lax.broadcasted_iota(jnp.int32, (Lp, Dout), 0)
    valid = (row_id >= 1) & (row_id < 1 + seqlen)
    d = y - t_ref[...].astype(jnp.float32)
    d = jnp.where(valid, d * d, 0.0)
    s = jnp.sum(d, axis=1, keepdims=True)                   # (Lp, 1)
    s = jnp.sum(s, axis=0, keepdims=True)                   # (1, 1)
    loss_ref[...] = s * (1.0 / denom)


def _tx_block_kernel(x_ref, ln1w_ref, ln1b_ref, wqkv_ref, bqkv_ref,
                     wo_ref, bo_ref, ln2w_ref, ln2b_ref,
                     wfc1_ref, bfc1_ref, wfc2_ref, bfc2_ref, o_ref,
                     *, nhead, n_valid):
    # Full pre-LN ViT block on one batch element, sequence padded to Lp (mult of 128).
    # Rows >= n_valid are padding: masked as keys, zeroed at the output.
    x = x_ref[...].astype(jnp.float32)                      # (Lp, D)
    Lp, D = x.shape
    dh = D // nhead
    scale = float(dh) ** -0.5

    # In-kernel masks (no HBM mask tensors).
    col_id = lax.broadcasted_iota(jnp.int32, (Lp, Lp), 1)
    key_ok = col_id < n_valid
    row_id = lax.broadcasted_iota(jnp.int32, (Lp, D), 0)
    row_ok = row_id < n_valid

    # --- LayerNorm 1 + fused QKV projection (qkv_bias=True) ---
    xn = _ln(x, ln1w_ref[...], ln1b_ref[...]).astype(BF16)
    qkv = jnp.dot(xn, wqkv_ref[...], preferred_element_type=jnp.float32)
    qkv = qkv + bqkv_ref[...]                               # (Lp, 3D)

    # --- Multi-head self-attention (per-head lane slices of the fused result) ---
    heads = []
    for h in range(nhead):                                  # static, unrolled
        q = qkv[:, h * dh:(h + 1) * dh] * scale
        k = qkv[:, D + h * dh: D + (h + 1) * dh]
        v = qkv[:, 2 * D + h * dh: 2 * D + (h + 1) * dh]
        s = lax.dot_general(q.astype(BF16), k.astype(BF16),
                            (((1,), (1,)), ((), ())),
                            preferred_element_type=jnp.float32)   # (Lp, Lp)
        s = jnp.where(key_ok, s, -1e30)                     # kill padded keys (f32)
        s = s - jnp.max(s, axis=-1, keepdims=True)
        p = jnp.exp(s)
        p = p * pl.reciprocal(jnp.sum(p, axis=-1, keepdims=True), approx=True)
        heads.append(jnp.dot(p.astype(BF16), v.astype(BF16),
                             preferred_element_type=jnp.float32))  # (Lp, dh)
    attn = jnp.concatenate(heads, axis=-1)                  # (Lp, D)
    attn = jnp.dot(attn.astype(BF16), wo_ref[...],
                   preferred_element_type=jnp.float32) + bo_ref[...]
    x = x + attn

    # --- LayerNorm 2 + MLP (ratio 4, GELU) ---
    xn2 = _ln(x, ln2w_ref[...], ln2b_ref[...]).astype(BF16)
    h1 = jnp.dot(xn2, wfc1_ref[...], preferred_element_type=jnp.float32) + bfc1_ref[...]
    # TODO(synk): PyTorch nn.GELU default is the exact erf form; tanh approximation
    # used here for guaranteed Mosaic lowering (difference ~1e-3).
    h1 = jax.nn.gelu(h1, approximate=True)
    h2 = jnp.dot(h1.astype(BF16), wfc2_ref[...], preferred_element_type=jnp.float32)
    h2 = h2 + bfc2_ref[...]
    out = x + h2
    o_ref[...] = jnp.where(row_ok, out, 0.0).astype(o_ref.dtype)   # keep pads at 0


# ----------------------------- Pallas wrappers -----------------------------

def pallas_embed(x, w_bf16, b, pos):
    """x: (B, L, in_dim);  w: (in_dim, E) bf16;  b: (1, E);  pos: (L, E)."""
    B, L, Din = x.shape
    E = w_bf16.shape[1]
    return pl.pallas_call(
        _embed_kernel,
        out_shape=jax.ShapeDtypeStruct((B, L, E), ACT_DTYPE),
        grid=(B,),
        in_specs=[_batch_spec((L, Din)), _const_spec((Din, E)),
                  _const_spec((1, E)), _const_spec((L, E))],
        out_specs=_batch_spec((L, E)),
        compiler_params=_CP,
    )(x, w_bf16, b, pos)


def pallas_ln_linear(x, nw, nb, w_bf16, b):
    B, Lp, Din = x.shape
    Dout = w_bf16.shape[1]
    return pl.pallas_call(
        _ln_linear_kernel,
        out_shape=jax.ShapeDtypeStruct((B, Lp, Dout), ACT_DTYPE),
        grid=(B,),
        in_specs=[_batch_spec((Lp, Din)), _const_spec((1, Din)), _const_spec((1, Din)),
                  _const_spec((Din, Dout)), _const_spec((1, Dout))],
        out_specs=_batch_spec((Lp, Dout)),
        compiler_params=_CP,
    )(x, nw, nb, w_bf16, b)


def pallas_pred_loss(x, nw, nb, w_bf16, b, tgt, seqlen, denom):
    B, Lp, Din = x.shape
    Dout = w_bf16.shape[1]
    kern = functools.partial(_pred_loss_kernel, denom=float(denom), seqlen=int(seqlen))
    pred, loss = pl.pallas_call(
        kern,
        out_shape=(jax.ShapeDtypeStruct((B, Lp, Dout), jnp.float32),
                   jax.ShapeDtypeStruct((B, 1, 1), jnp.float32)),
        grid=(B,),
        in_specs=[_batch_spec((Lp, Din)), _const_spec((1, Din)), _const_spec((1, Din)),
                  _const_spec((Din, Dout)), _const_spec((1, Dout)),
                  _batch_spec((Lp, Dout))],
        out_specs=(_batch_spec((Lp, Dout)), _batch_spec((1, 1))),
        compiler_params=_CP,
    )(x, nw, nb, w_bf16, b, tgt)
    return pred, loss


def pallas_tx_block(x, bp, nhead, n_valid):
    """x: (B, Lp, D) bf16 (Lp multiple of 128); bp: pre-prepared block params."""
    B, Lp, D = x.shape
    args = (x, bp['ln1_w'], bp['ln1_b'], bp['wqkv'], bp['bqkv'],
            bp['wproj'], bp['bproj'], bp['ln2_w'], bp['ln2_b'],
            bp['wfc1'], bp['bfc1'], bp['wfc2'], bp['bfc2'])
    in_specs = [_batch_spec((Lp, D))] + [_const_spec(a.shape) for a in args[1:]]
    kern = functools.partial(_tx_block_kernel, nhead=nhead, n_valid=int(n_valid))
    # TODO(synk): at real sizes, add pipeline_mode=pl.Buffered(1) to the
    # constant-index weight specs (halves weight VMEM on v7x) and tile over KV.
    return pl.pallas_call(
        kern,
        out_shape=jax.ShapeDtypeStruct((B, Lp, D), ACT_DTYPE),
        grid=(B,),
        in_specs=in_specs,
        out_specs=_batch_spec((Lp, D)),
        compiler_params=_CP,
    )(*args)


# ----------------------------- Model pieces (JAX glue) -----------------------------

def sincos_pos_embed(seqlen, dim):
    """1-D sin/cos positional embedding with a zero cls row, (seqlen+1, dim)."""
    pos = np.arange(seqlen, dtype=np.float64)
    omega = np.arange(dim // 2, dtype=np.float64) / (dim / 2.0)
    omega = 1.0 / (10000.0 ** omega)
    out = np.einsum('l,d->ld', pos, omega)
    emb = np.concatenate([np.sin(out), np.cos(out)], axis=1)
    emb = np.concatenate([np.zeros((1, dim)), emb], axis=0)
    return emb.astype(np.float32)


def missing_wedge_ids(seqlen, angle_range, angle_step):
    # TODO(synk): `missing_wedge_mask` source was not provided; deterministic
    # reimplementation: tokens whose projection angle (index * angle_step) lies
    # inside [angle_range[0], angle_range[1]) degrees are the missing wedge
    # (mask=1); the rest are kept.  ids_restore follows MAE conventions.
    angles = np.arange(seqlen) * float(angle_step)
    in_wedge = (angles >= angle_range[0]) & (angles < angle_range[1])
    masked = np.nonzero(in_wedge)[0]
    kept = np.nonzero(~in_wedge)[0]
    ids_shuffle = np.concatenate([kept, masked])
    ids_restore = np.argsort(ids_shuffle)
    mask = np.ones(seqlen, np.float32)
    mask[kept] = 0.0
    return kept.astype(np.int32), ids_restore.astype(np.int32), mask


def xavier_uniform(key, shape):
    limit = float(np.sqrt(6.0 / (shape[0] + shape[1])))
    return jax.random.uniform(key, shape, jnp.float32, -limit, limit)


def init_block_params(key, dim):
    # Weights are stored already in kernel layout (fused QKV, bf16, (1,D) biases)
    # so the forward pass does zero per-call weight reshuffling.
    ks = jax.random.split(key, 4)
    return dict(
        ln1_w=jnp.ones((1, dim), jnp.float32), ln1_b=jnp.zeros((1, dim), jnp.float32),
        wqkv=xavier_uniform(ks[0], (dim, 3 * dim)).astype(BF16),
        bqkv=jnp.zeros((1, 3 * dim), jnp.float32),
        wproj=xavier_uniform(ks[1], (dim, dim)).astype(BF16),
        bproj=jnp.zeros((1, dim), jnp.float32),
        ln2_w=jnp.ones((1, dim), jnp.float32), ln2_b=jnp.zeros((1, dim), jnp.float32),
        wfc1=xavier_uniform(ks[2], (dim, 4 * dim)).astype(BF16),
        bfc1=jnp.zeros((1, 4 * dim), jnp.float32),
        wfc2=xavier_uniform(ks[3], (4 * dim, dim)).astype(BF16),
        bfc2=jnp.zeros((1, dim), jnp.float32),
    )


def init_sino_tx_params(key, seqlen, in_dim, cfg):
    E, Dd = cfg['enc_emb_dim'], cfg['dec_emb_dim']
    keys = jax.random.split(key, 5 + cfg['enc_nlayer'] + cfg['dec_nlayer'])
    it = iter(keys)
    p = {}
    # encoder
    p['enc_proj_w'] = xavier_uniform(next(it), (in_dim, E)).astype(BF16)
    p['enc_proj_b'] = jnp.zeros((1, E), jnp.float32)
    p['cls_token'] = 0.02 * jax.random.normal(next(it), (1, 1, E), jnp.float32)
    p['enc_pos_emb'] = jnp.asarray(sincos_pos_embed(seqlen, E))[None]     # (1, L+1, E)
    p['enc_blocks'] = [init_block_params(next(it), E) for _ in range(cfg['enc_nlayer'])]
    p['enc_norm_w'] = jnp.ones((1, E), jnp.float32)
    p['enc_norm_b'] = jnp.zeros((1, E), jnp.float32)
    # decoder
    p['dec_proj_w'] = xavier_uniform(next(it), (E, Dd)).astype(BF16)
    p['dec_proj_b'] = jnp.zeros((1, Dd), jnp.float32)
    p['mask_token'] = 0.02 * jax.random.normal(next(it), (1, 1, Dd), jnp.float32)
    p['dec_pos_emb'] = jnp.asarray(sincos_pos_embed(seqlen, Dd))[None]    # (1, L+1, Dd)
    p['dec_blocks'] = [init_block_params(next(it), Dd) for _ in range(cfg['dec_nlayer'])]
    p['dec_norm_w'] = jnp.ones((1, Dd), jnp.float32)
    p['dec_norm_b'] = jnp.zeros((1, Dd), jnp.float32)
    p['dec_pred_w'] = xavier_uniform(next(it), (Dd, in_dim)).astype(BF16)
    p['dec_pred_b'] = jnp.zeros((1, in_dim), jnp.float32)
    return p


def sino_tx_forward(params, imgs, cfg, seqlen):
    """imgs: (B, 1, L, in_dim) NCHW (C=1).  Returns (loss, pred, mask)."""
    B = imgs.shape[0]
    in_dim = imgs.shape[-1]
    E, Dd = cfg['enc_emb_dim'], cfg['dec_emb_dim']
    kept, ids_restore, mask1d = missing_wedge_ids(seqlen, cfg['angle_range'], cfg['angle_step'])
    x2d = imgs[:, 0]                                                    # (B, L, in_dim)

    # ---------------- Encoder ----------------
    emb = pallas_embed(x2d, params['enc_proj_w'], params['enc_proj_b'],
                       params['enc_pos_emb'][0, 1:, :])                 # (B, L, E) bf16
    tmp_kept = emb[:, kept, :]                                          # visible tokens
    cls = (params['cls_token'] + params['enc_pos_emb'][:, :1, :]).astype(emb.dtype)
    cls = jnp.broadcast_to(cls, (B, 1, E))
    t1 = jnp.concatenate([cls, tmp_kept], axis=1)                       # (B, Le, E)
    Le = t1.shape[1]
    Lp_e = _round_up(Le, 128)                                           # lane-dense rows
    t1p = jnp.pad(t1, ((0, 0), (0, Lp_e - Le), (0, 0))).astype(ACT_DTYPE)
    for bp in params['enc_blocks']:
        t1p = pallas_tx_block(t1p, bp, cfg['enc_nhead'], n_valid=Le)

    # ---------------- Decoder (enc_norm fused into dec_proj) ----------------
    dxp = pallas_ln_linear(t1p, params['enc_norm_w'], params['enc_norm_b'],
                           params['dec_proj_w'], params['dec_proj_b'])  # (B, Lp_e, Dd)
    dx = dxp[:, :Le, :].astype(jnp.float32)
    n_mask = seqlen + 1 - Le
    mask_tokens = jnp.broadcast_to(params['mask_token'], (B, n_mask, Dd))
    x_ = jnp.concatenate([dx[:, 1:, :], mask_tokens], axis=1)           # (B, L, Dd)
    x_ = x_[:, ids_restore, :]                                          # unshuffle
    dxx = jnp.concatenate([dx[:, :1, :], x_], axis=1) + params['dec_pos_emb']
    Ld = seqlen + 1
    Lp_d = _round_up(Ld, 128)
    dxxp = jnp.pad(dxx, ((0, 0), (0, Lp_d - Ld), (0, 0))).astype(ACT_DTYPE)
    for bp in params['dec_blocks']:
        dxxp = pallas_tx_block(dxxp, bp, cfg['dec_nhead'], n_valid=Ld)

    # ---------------- dec_norm + dec_pred + MSE (fused) ----------------
    tgt = jnp.concatenate([jnp.zeros((B, 1, in_dim), jnp.float32), x2d,
                           jnp.zeros((B, Lp_d - Ld, in_dim), jnp.float32)], axis=1)
    pred_pad, loss_parts = pallas_pred_loss(
        dxxp, params['dec_norm_w'], params['dec_norm_b'],
        params['dec_pred_w'], params['dec_pred_b'], tgt,
        seqlen=seqlen, denom=B * seqlen * in_dim)
    loss = jnp.sum(loss_parts)
    pred = pred_pad[:, 1:seqlen + 1, :]                                 # drop cls / pad

    mask = jnp.broadcast_to(jnp.asarray(mask1d)[None, :], (B, seqlen))
    return loss, pred, mask


# ----------------------------- Demo -----------------------------

if __name__ == "__main__":
    seqlen = 16          # number of projection angles (token sequence length)
    in_dim = 128         # detector bins per projection (lane-dense: multiple of 128)
    cfg = dict(
        enc_emb_dim=128, dec_emb_dim=128,     # lane-dense embedding dims
        enc_nhead=4, dec_nhead=4,             # head_dim = 32
        enc_nlayer=2, dec_nlayer=2,
        angle_range=(60.0, 120.0),            # missing wedge, degrees
        angle_step=180.0 / seqlen,
    )

    key = jax.random.PRNGKey(0)
    kp, kx = jax.random.split(key)
    params = init_sino_tx_params(kp, seqlen, in_dim, cfg)
    imgs = jax.random.normal(kx, (2, 1, seqlen, in_dim), jnp.float32)   # NCHW, C=1

    loss, pred, mask = sino_tx_forward(params, imgs, cfg, seqlen)
    jax.block_until_ready((loss, pred, mask))

    assert pred.shape == (2, seqlen, in_dim)
    assert mask.shape == (2, seqlen)
    assert loss.shape == ()
    assert bool(jnp.isfinite(loss))
    print("KERNEL_OK")
</pallas_src>

<mosaic_0001>
module attributes {stable_mosaic.version = 11 : i64} {
  func.func @_embed_kernel(%arg0: i32, %arg1: memref<1x16x128xf32, #tpu.memory_space<vmem>>, %arg2: memref<128x128xbf16, #tpu.memory_space<vmem>>, %arg3: memref<1x128xf32, #tpu.memory_space<vmem>>, %arg4: memref<16x128xf32, #tpu.memory_space<vmem>>, %arg5: memref<1x16x128xbf16, #tpu.memory_space<vmem>>) attributes {dimension_semantics = [#tpu.dimension_semantics<parallel>], iteration_bounds = array<i64: 2>, scalar_prefetch = 0 : i64, scratch_operands = 0 : i64, tpu.core_type = #tpu.core_type<tc>, window_params = [{transform_indices = @transform_0, window_bounds = array<i64: 1, 16, 128>}, {pipeline_mode = #tpu.pipeline_mode<synchronous>, transform_indices = @transform_1, window_bounds = array<i64: 128, 128>}, {pipeline_mode = #tpu.pipeline_mode<synchronous>, transform_indices = @transform_2, window_bounds = array<i64: 1, 128>}, {pipeline_mode = #tpu.pipeline_mode<synchronous>, transform_indices = @transform_3, window_bounds = array<i64: 16, 128>}, {transform_indices = @transform_4, window_bounds = array<i64: 1, 16, 128>}]} {
    %c0 = arith.constant 0 : index
    %c0_0 = arith.constant 0 : index
    %c0_1 = arith.constant 0 : index
    %0 = vector.load %arg1[%c0, %c0_0, %c0_1] : memref<1x16x128xf32, #tpu.memory_space<vmem>>, vector<1x16x128xf32>
    %1 = vector.shape_cast %0 : vector<1x16x128xf32> to vector<16x128xf32>
    %2 = arith.truncf %1 : vector<16x128xf32> to vector<16x128xbf16>
    %c0_2 = arith.constant 0 : index
    %c0_3 = arith.constant 0 : index
    %3 = vector.load %arg2[%c0_2, %c0_3] : memref<128x128xbf16, #tpu.memory_space<vmem>>, vector<128x128xbf16>
    %cst = arith.constant dense<0.000000e+00> : vector<16x128xf32>
    %4 = tpu.matmul %2, %3, %cst {dimension_numbers = #tpu.dot_dimension_numbers<[1], [0], [0], [1], [0, 0, 1, 1], [], []>} : vector<16x128xbf16>, vector<128x128xbf16>, vector<16x128xf32> -> vector<16x128xf32>
    %c0_4 = arith.constant 0 : index
    %c0_5 = arith.constant 0 : index
    %5 = vector.load %arg3[%c0_4, %c0_5] : memref<1x128xf32, #tpu.memory_space<vmem>>, vector<1x128xf32>
    %6 = vector.broadcast %5 : vector<1x128xf32> to vector<16x128xf32>
    %7 = arith.addf %4, %6 : vector<16x128xf32>
    %c0_6 = arith.constant 0 : index
    %c0_7 = arith.constant 0 : index
    %8 = vector.load %arg4[%c0_6, %c0_7] : memref<16x128xf32, #tpu.memory_space<vmem>>, vector<16x128xf32>
    %9 = arith.addf %7, %8 : vector<16x128xf32>
    %10 = arith.truncf %9 : vector<16x128xf32> to vector<16x128xbf16>
    %c0_8 = arith.constant 0 : index
    %c0_9 = arith.constant 0 : index
    %c0_10 = arith.constant 0 : index
    %11 = vector.load %arg5[%c0_8, %c0_9, %c0_10] : memref<1x16x128xbf16, #tpu.memory_space<vmem>>, vector<1x16x128xbf16>
    %12 = vector.shape_cast %11 : vector<1x16x128xbf16> to vector<16x128xbf16>
    %13 = vector.shape_cast %10 : vector<16x128xbf16> to vector<1x16x128xbf16>
    tpu.vector_store %arg5[%c0_8, %c0_9, %c0_10], %13 {strides = array<i32>} : memref<1x16x128xbf16, #tpu.memory_space<vmem>>, vector<1x16x128xbf16>,
    return
  }
  func.func @transform_0(%arg0: i32) -> (i32, i32, i32) {
    %c0_i32 = arith.constant 0 : i32
    %c0_i32_0 = arith.constant 0 : i32
    %c0_i32_1 = arith.constant 0 : i32
    return %arg0, %c0_i32, %c0_i32_0 : i32, i32, i32
  }
  func.func @transform_1(%arg0: i32) -> (i32, i32) {
    %c0_i32 = arith.constant 0 : i32
    %c0_i32_0 = arith.constant 0 : i32
    %c0_i32_1 = arith.constant 0 : i32
    return %c0_i32, %c0_i32_0 : i32, i32
  }
  func.func @transform_2(%arg0: i32) -> (i32, i32) {
    %c0_i32 = arith.constant 0 : i32
    %c0_i32_0 = arith.constant 0 : i32
    %c0_i32_1 = arith.constant 0 : i32
    return %c0_i32, %c0_i32_0 : i32, i32
  }
  func.func @transform_3(%arg0: i32) -> (i32, i32) {
    %c0_i32 = arith.constant 0 : i32
    %c0_i32_0 = arith.constant 0 : i32
    %c0_i32_1 = arith.constant 0 : i32
    return %c0_i32, %c0_i32_0 : i32, i32
  }
  func.func @transform_4(%arg0: i32) -> (i32, i32, i32) {
    %c0_i32 = arith.constant 0 : i32
    %c0_i32_0 = arith.constant 0 : i32
    %c0_i32_1 = arith.constant 0 : i32
    return %arg0, %c0_i32, %c0_i32_0 : i32, i32, i32
  }
}

</mosaic_0001>

<bundles_post_ra>
// kernel: tpu_custom_call.1
= control target key start
LH: loop header
LB: loop body
LE: loop exit
PB: predicated region body
PF: predicated region fallthrough
CT: control target
= control target key end

     0   :  { %9 = vsyncpa [#allocation3], 0  ;;  %s1074_s0 = inlined_call_operand.hbm [shape: f32[2,16,128], index: 0, kind: input, shape index: {}]   ;;  %s1075_s1 = inlined_call_operand.hbm [shape: bf16[128,128], index: 1, kind: input, shape index: {}]   ;;  %s1076_s2 = inlined_call_operand.vmem [shape: f32[1,128], index: 2, kind: input, shape index: {}]   ;;  %s1077_s3 = inlined_call_operand.hbm [shape: f32[16,128], index: 3, kind: input, shape index: {}]   ;;  %s1078_s4 = inlined_call_operand.hbm [shape: bf16[2,16,128], index: 4, kind: output, shape index: {}]  }
   0x1   :  { %11 = vsyncpa [#allocation3 + $0x1], 0 }
   0x2   :  { %12 = vsyncpa [#allocation6], 0 }
   0x3   :  { %13 = vsyncpa [#allocation4], 0 }
   0x4   :  { %15 = vsyncpa [#allocation4 + $0x1], 0  ;;  %s826_s15 = smov 0   ;;  %s828_s16 = smov 0  }
   0x5   :  { %s830_s17 = smov 0   ;;  %s832_s18 = smov 0  }
   0x6 LB: > { %s847_s19 = sadd.s32 4294967295, %s787_s18   ;;  %s481_s20 = sadd.s32 4294967294, %s787_s18   ;;  %s787_s18 = sphi %s832_s18, %s1098_s18   ;;  %s783_s17 = sphi %s830_s17, %s1097_s17   ;;  %s779_s16 = sphi %s828_s16, %s1096_s16   ;;  %s775_s15 = sphi %s826_s15, %s1095_s15  }
   0x7   : > { %p41_p0 = scmp.ne.s32.totalorder %s779_s16, %s775_s15  ;;  %p1079_p1 = scmp.eq.s32.totalorder %s847_s19, 0 }
   0x8   : > { %p134_p3 = scmp.eq.s32.totalorder %s481_s20, 1  ;;  %p482_p5 = scmp.ge.s32.totalorder %s787_s18, 1 }
   0x9   : > { %p856_p4 = por %p1079_p1, %p41_p0  ;;  %p141_p7 = scmp.lt.s32.totalorder %s787_s18, 3 }
   0xa   : > { %p861_p6 = por %p134_p3, %p41_p0  ;;  %s789_s24 = smov [#allocation5]  }
   0xb   : > { %s1082_s21 = scalar_select %p856_p4, 1, 0 }
   0xc   : > { %s1083_s22 = scalar_select %p861_p6, 1, 0 }
   0xd   : > { %p866_p8 = pnand %p482_p5, %p141_p7  ;;  %s153_s25 = sshll.u32 %s789_s24, 4  ;;  %s870_s25 = int_to_ptr.vmem [resolvable:$true] %s153_s25 }
   0xe   : > { %s790_s27 = smov [#allocation7]   ;;  %s631_s5 = scalar_lea.hbm %s1075_s1, 1024 }
   0xf   : > { %p560_p9 = pneg %p866_p8  ;;  %s169_s28 = sshll.u32 %s790_s27, 4  ;;  %s881_s28 = int_to_ptr.vmem [resolvable:$true] %s169_s28 }
  0x10   : > { %p632_p12 = scmp.ne.s32.totalorder %s1075_s1, %s631_s5  ;;  %p638_p5 = scmp.lt.u32.totalorder %s631_s5, %s1075_s1 }
  0x11   : > { %p877_p11 = pnand %p560_p9, %p1079_p1 }
  0x13   : > { %p633_p13 = pneg %p877_p11 }
  0x15   : > { %p634_p0 = pnand %p633_p13, %p632_p12 }
  0x17   : > { %p635_p3 = pneg %p634_p0 }
  0x19   : > { %p640_p7 = pnand %p638_p5, %p635_p3 }
  0x1b   : > { %643 = shalt.err (!%p640_p7)
}
  0x1c   : > { %s644_s10 = scalar_lea.vmem %s870_s25, 1024  ;;  %p652_p2 = scmp.lt.s32.totalorder %s870_s25, %s870_s25 }
  0x1d   : > { %p645_p9 = scmp.ne.s32.totalorder %s870_s25, %s644_s10  ;;  %p653_p12 = scmp.lt.s32.totalorder %s644_s10, %s644_s10 }
  0x1f   : > { %p647_p10 = pnand %p645_p9, %p633_p13  ;;  %p654_p0 = por %p653_p12, %p652_p2 }
  0x21   : > { %p648_p1 = pneg %p647_p10 }
  0x23   : > { %p655_p6 = pnand %p654_p0, %p648_p1 }
  0x25   : > { %658 = shalt.err (!%p655_p6)
}
  0x26   : > { %s791_s11 = smov 64   ;;  %s792_s12 = smov 4  }
  0x27   : > { %563 = dma.hbm_to_vmem [thread:$0]  (!%p877_p11), %s1075_s1, 1024, %s870_s25, [#allocation6], %s791_s11, %s791_s11, %s792_s12  }
  0x28   : > { %s659_s27 = scalar_lea.hbm %s1077_s3, 256 }
  0x29   : > { %p660_p2 = scmp.ne.s32.totalorder %s1077_s3, %s659_s27  ;;  %p666_p10 = scmp.lt.u32.totalorder %s659_s27, %s1077_s3 }
  0x2b   : > { %p662_p1 = pnand %p660_p2, %p633_p13 }
  0x2d   : > { %p663_p6 = pneg %p662_p1 }
  0x2f   : > { %p668_p3 = pnand %p666_p10, %p663_p6 }
  0x31   : > { %671 = shalt.err (!%p668_p3)
}
  0x32   : > { %s672_s25 = scalar_lea.vmem %s881_s28, 256  ;;  %p680_p12 = scmp.lt.s32.totalorder %s881_s28, %s881_s28 }
  0x33   : > { %p673_p5 = scmp.ne.s32.totalorder %s881_s28, %s672_s25  ;;  %p681_p0 = scmp.lt.s32.totalorder %s672_s25, %s672_s25 }
  0x35   : > { %p675_p7 = pnand %p673_p5, %p633_p13  ;;  %p682_p2 = por %p681_p0, %p680_p12 }
  0x37   : > { %p676_p9 = pneg %p675_p7 }
  0x39   : > { %p683_p1 = pnand %p682_p2, %p676_p9 }
  0x3b   : > { %686 = shalt.err (!%p683_p1)
}
  0x3c   : > { %s793_s7 = smov 128   ;;  %s794_s8 = smov 8  }
  0x3d   : > { %566 = dma.hbm_to_vmem [thread:$0]  (!%p877_p11), %s1077_s3, 256, %s881_s28, [#allocation6], %s793_s7, %s793_s7, %s794_s8  }
  0x3e   : > { %s939_s11 = sadd.s32 1, %s787_s18   ;;  %s28_s13 = sadd.s32 1, %s783_s17 }
  0x3f   : > { %s25_s12 = ssub.s32 %s787_s18, %s939_s11  ;;  %p35_p6 = scmp.ne.s32.totalorder %s783_s17, %s779_s16 }
  0x40   : > { %p26_p13 = scmp.eq.s32.totalorder %s25_s12, 0  ;;  %p36_p10 = scmp.eq.s32.totalorder %s787_s18, 0 }
  0x41   : > { %p1086_p5 = scmp.eq.s32.totalorder %s847_s19, 1  ;;  %p577_p9 = scmp.lt.s32.totalorder %s787_s18, 2 }
  0x42   : > { %s948_s14 = scalar_select %p26_p13, %s783_s17, %s28_s13  }
  0x43   : > { %p37_p3 = por %p36_p10, %p35_p6  ;;  %p952_p7 = por %p1086_p5, %p35_p6 }
  0x44   : > { %s183_s20 = sand.u32 1, %s783_s17   ;;  %s510_s28 = sshll.u32 %s787_s18, 8 }
  0x45   : > { %s1087_s26 = scalar_select %p952_p7, 1, 0 }
  0x46   : > { %s486_s24 = sshll.u32 %s183_s20, 4  ;;  %s962_s30 = scalar_lea.hbm %s1074_s0, %s510_s28 }
  0x47   : > { %s187_s5 = scalar_lea.vmem [#allocation2], %s486_s24  ;;  %p966_p11 = pnand %p577_p9, %p37_p3 }
  0x48   : > { %s194_s6 = sshll.u32 %s187_s5, 4  ;;  %s970_s9 = scalar_lea.sflag [#allocation3], %s183_s20  ;;  %s964_s6 = int_to_ptr.vmem [resolvable:$true] %s194_s6 }
  0x49   : > { %s687_s10 = scalar_lea.hbm %s962_s30, 256  ;;  %p689_p0 = pneg %p966_p11 }
  0x4a   : > { %p688_p12 = scmp.ne.s32.totalorder %s962_s30, %s687_s10  ;;  %s692_s24 = scalar_lea.hbm %s1074_s0, 512 }
  0x4b   : > { %p693_p13 = scmp.lt.u32.totalorder %s962_s30, %s1074_s0  ;;  %p694_p6 = scmp.lt.u32.totalorder %s692_s24, %s687_s10 }
  0x4c   : > { %p690_p2 = pnand %p689_p0, %p688_p12  ;;  %p696_p3 = scmp.lt.u32.totalorder %s687_s10, %s962_s30 }
  0x4d   : > { %p695_p10 = por %p694_p6, %p693_p13 }
  0x4e   : > { %p691_p1 = pneg %p690_p2 }
  0x4f   : > { %p697_p5 = por %p696_p3, %p695_p10 }
  0x51   : > { %p698_p9 = pnand %p697_p5, %p691_p1 }
  0x53   : > { %701 = shalt.err (!%p698_p9)
}
  0x54   : > { %s702_s20 = scalar_lea.vmem %s964_s6, 256  ;;  %s795_s29 = smov [#allocation2]  }
  0x55   : > { %p703_p12 = scmp.ne.s32.totalorder %s964_s6, %s702_s20  ;;  %s707_s5 = sshll.u32 %s795_s29, 4  ;;  %s708_s5 = int_to_ptr.vmem [resolvable:$false] %s707_s5 }
  0x56   : > { %s709_s12 = scalar_lea.vmem %s708_s5, 512  ;;  %p710_p4 = scmp.lt.s32.totalorder %s964_s6, %s708_s5 }
  0x57   : > { %p705_p2 = pnand %p703_p12, %p689_p0  ;;  %p711_p13 = scmp.lt.s32.totalorder %s709_s12, %s702_s20 }
  0x59   : > { %p706_p7 = pneg %p705_p2  ;;  %p712_p6 = por %p711_p13, %p710_p4 }
  0x5b   : > { %p713_p10 = pnand %p712_p6, %p706_p7 }
  0x5d   : > { %716 = shalt.err (!%p713_p10)
}
  0x5e   : > { %570 = dma.hbm_to_vmem [thread:$0]  (!%p966_p11), %s962_s30, 256, %s964_s6, %s970_s9, %s793_s7, %s793_s7, %s794_s8  }
  0x5f   : > { %206 = sbr.rel (%p866_p8) target bundleno = 374 (0x176), region = 36  ;;  %s1004_s10 = sand.u32 (!%p866_p8), 1, %s779_s16  }
  0x60   : > { %s490_s13 = sshll.u32 (!%p866_p8), %s1004_s10, 4  ;;  %s209_s24 = scalar_lea.sflag (!%p866_p8), [#allocation3], %s1004_s10 }
  0x61   : > { %s1008_s28 = scalar_lea.vmem (!%p866_p8), [#allocation2], %s490_s13  ;;  %p1089_p4 = scmp.ne.s32.totalorder (!%p866_p8), %s1082_s21, 0 }
  0x66   : > { %762 = dma.done.wait (%p1089_p4), %s209_s24, 256  }
  0x67   : > { %764 = vsyncadd (%p1089_p4), %s209_s24, 4294967040  ;;  %p1090_p7 = scmp.eq.s32.totalorder %s847_s19, 0 }
  0x69   : > { %766 = dma.done.wait (%p1090_p7), [#allocation6], 1280   ;;  %p1091_p8 = pmov %p1090_p7 }
  0x6a   : > { %v796_v0 = vmov 0.0   ;;  %vm797_vm0 = vmmov 0   ;;  %v623_v1 = vld [vmem:[#allocation5] sm:$0xff]   ;;  %v624_v2 = vld [vmem:[#allocation5 + $0x8] sm:$0xff]   ;;  %v625_v3 = vld [vmem:[#allocation5 + $0x10] sm:$0xff]   ;;  %s493_s21 = sshll.u32 %s1004_s10, 3 }
  0x6b   : > { %768 = vsyncadd (%p1091_p8), [#allocation6], 4294966016  ;;  %528 = vmatprep.subr.bf16.mxu0 %v796_v0  ;;  %544 = vmatprep.mubr.msk.bf16.mxu0 %vm797_vm0, %v796_v0  ;;  %v626_v4 = vld [vmem:[#allocation5 + $0x18] sm:$0xff]   ;;  %v627_v5 = vld [vmem:[#allocation5 + $0x20] sm:$0xff]   ;;  %s513_s8 = sshll.u32 %s847_s19, 7  ;;  %s244_s30 = scalar_lea.vmem [#allocation8], %s493_s21 }
  0x6c   : > { %529 = vmatpush3.bf16.msra.mxu0 %v623_v1  ;;  %v628_v6 = vld [vmem:[#allocation5 + $0x28] sm:$0xff]   ;;  %v629_v7 = vld [vmem:[#allocation5 + $0x30] sm:$0xff]   ;;  %v630_v8 = vld [vmem:[#allocation5 + $0x38] sm:$0xff]   ;;  %s389_s6 = sshll.u32 %s244_s30, 4  ;;  %s1028_s27 = scalar_lea.hbm %s1078_s4, %s513_s8  ;;  %s1030_s6 = int_to_ptr.vmem [resolvable:$true] %s389_s6 }
  0x6d   : > { %530 = vmatprep.subr.bf16.mxu0 %v796_v0  ;;  %v246_v9 = vld [vmem:[%s1008_s28] sm:$0xff]  ;;  %v247_v10 = vld [vmem:[%s1008_s28 + $0x8] sm:$0xff]  ;;  %s376_s20 = scalar_lea.sflag [#allocation4], %s1004_s10  ;;  %s717_s29 = scalar_lea.vmem %s1030_s6, 128 }
  0x6e   : > { %v248_v11 = vpack.c.bf16 %v247_v10, %v246_v9  ;;  %v494_v12 = vld [vmem:[%s1076_s2] ss:$0 sm:$0xff]  ;;  %v362_v18 = vld [vmem:[#allocation7 + $0x8] sm:$0xff]  ;;  %p718_p11 = scmp.ne.s32.totalorder %s1030_s6, %s717_s29  ;;  %p1092_p0 = scmp.ne.s32.totalorder %s1087_s26, 0 }
  0x6f   : > { %v361_v16 = vld [vmem:[#allocation7] sm:$0xff]  ;;  %s798_s19 = smov [#allocation8]  }
  0x70   : > { %531 = vmatpush3.bf16.msra.mxu0 %v624_v2  ;;  %p719_p1 = pnand %p718_p11, %p1092_p0  ;;  %s721_s5 = sshll.u32 %s798_s19, 4  ;;  %s722_s5 = int_to_ptr.vmem [resolvable:$false] %s721_s5 }
  0x71   : > { %532 = vmatprep.subr.bf16.mxu0 %v796_v0  ;;  %s723_s12 = scalar_lea.vmem %s722_s5, 256  ;;  %p724_p5 = scmp.lt.s32.totalorder %s1030_s6, %s722_s5 }
  0x72   : > { %p720_p3 = pneg %p719_p1  ;;  %p725_p9 = scmp.lt.s32.totalorder %s723_s12, %s717_s29 }
  0x74   : > { %533 = vmatpush3.bf16.msra.mxu0 %v625_v3  ;;  %p726_p12 = por %p725_p9, %p724_p5 }
  0x75   : > { %534 = vmatprep.subr.bf16.mxu0 %v796_v0 }
  0x76   : > { %p727_p2 = pnand %p726_p12, %p720_p3 }
  0x78   : > { %535 = vmatpush3.bf16.msra.mxu0 %v626_v4 }
  0x79   : > { %536 = vmatprep.subr.bf16.mxu0 %v796_v0 }
  0x7c   : > { %537 = vmatpush3.bf16.msra.mxu0 %v627_v5 }
  0x7d   : > { %538 = vmatprep.subr.bf16.mxu0 %v796_v0 }
  0x80   : > { %539 = vmatpush3.bf16.msra.mxu0 %v628_v6 }
  0x81   : > { %540 = vmatprep.subr.bf16.mxu0 %v796_v0 }
  0x84   : > { %541 = vmatpush3.bf16.msra.mxu0 %v629_v7 }
  0x85   : > { %542 = vmatprep.subr.bf16.mxu0 %v796_v0 }
  0x88   : > { %543 = vmatpush3.bf16.msra.mxu0 %v630_v8 }
  0x8b   : > { %545 = vmatmul.mubr.bf16.vlgmr.msra.gmra.mrb[0].mxu0 %v248_v11 }
 0x15e   : > { %v354_v13 = vpop.f32.mrb[0].mxu0 }
 0x15f   : > { %v355_v14 = vadd.f32 %v494_v12, %v354_v13  ;;  %v546_v15 = vpop.f32.mrb[1].mxu0 }
 0x160   : > { %v357_v17 = vpop.f32.mrb[2].mxu0 }
 0x161   : > { %v358_v19 = vadd.f32 %v494_v12, %v357_v17  ;;  %v547_v20 = vpop.f32.mrb[3].mxu0  ;;  %v363_v21 = vadd.f32 %v361_v16, %v355_v14 }
 0x163   : > { %v364_v22 = vadd.f32 %v362_v18, %v358_v19 }
 0x165   : > { %v517_v23 = vpack.c.bf16 %v364_v22, %v363_v21 }
 0x167   : > { %518 = vst [vmem:[%s244_s30] sm:$0xff] %v517_v23  }
 0x168   : > { %730 = shalt.err (!%p727_p2)
}
 0x169   : > { %s731_s13 = scalar_lea.hbm %s1028_s27, 128  ;;  %s735_s21 = scalar_lea.hbm %s1078_s4, 256 }
 0x16a   : > { %p732_p13 = scmp.ne.s32.totalorder %s1028_s27, %s731_s13  ;;  %p736_p4 = scmp.lt.u32.totalorder %s1028_s27, %s1078_s4 }
 0x16b   : > { %p737_p7 = scmp.lt.u32.totalorder %s735_s21, %s731_s13  ;;  %p739_p11 = scmp.lt.u32.totalorder %s731_s13, %s1028_s27 }
 0x16c   : > { %p733_p6 = pnand %p732_p13, %p1092_p0 }
 0x16d   : > { %p738_p8 = por %p737_p7, %p736_p4 }
 0x16e   : > { %p734_p10 = pneg %p733_p6 }
 0x16f   : > { %p740_p1 = por %p739_p11, %p738_p8 }
 0x171   : > { %p741_p3 = pnand %p740_p1, %p734_p10 }
 0x173   : > { %744 = shalt.err (!%p741_p3)
}
 0x174   : > { %s799_s8 = smov 64   ;;  %s800_s30 = smov 4  }
 0x175   : > { %558 = dma.vmem_to_hbm [thread:$0]  (%p1092_p0), %s1030_s6, 128, %s1028_s27, %s376_s20, %s799_s8, %s799_s8, %s800_s30  }
 0x176 PF: > { %s404_s25 = sand.u32 1, %s775_s15   ;;  %p1093_p5 = scmp.ne.s32.totalorder %s1083_s22, 0 }
 0x177   : > { %p1094_p9 = scmp.ge.s32.totalorder %s787_s18, 2  ;;  %s405_s9 = scalar_lea.sflag [#allocation4], %s404_s25 }
 0x179   : > { %p572_p12 = pnand %p1094_p9, %p1093_p5 }
 0x17b   : > { %770 = dma.done.wait (!%p572_p12), %s405_s9, 128  }
 0x17c   : > { %772 = vsyncadd (!%p572_p12), %s405_s9, 4294967168  ;;  %p18_p2 = scmp.ge.s32.totalorder %s939_s11, 4   ;;  %s1095_s15 = smov %s779_s16 }
 0x17d   : > { %s1096_s16 = smov %s783_s17  ;;  %s1097_s17 = smov %s948_s14 }
 0x17e   : > { %s1098_s18 = smov %s939_s11  ;;  %20 = sbr.rel (!%p18_p2) target bundleno = 6 (0x6), region = 89 }
 0x185   :  { %410 = vsyncpa [#allocation3], 1 }
 0x186   :  { %412 = vsyncpa [#allocation3 + $0x1], 1 }
 0x187   :  { %413 = vsyncpa [#allocation6], 1 }
 0x188   :  { %414 = vsyncpa [#allocation4], 1 }
 0x189   :  { %416 = vsyncpa [#allocation4 + $0x1], 1 }

</bundles_post_ra>
